<compile_context>
chip_gen: v7x
topology: tpu7x:2x2x1
jax: 0.10.0
libtpu: 0.0.40
codegen_flags: <defaults>
</compile_context>

<pallas_src>
import functools

import jax
import jax.numpy as jnp
from jax import lax
from jax.experimental import pallas as pl
from jax.experimental.pallas import tpu as pltpu

_EPSILON = 1e-08


def _tpu_hw_defaults():
    """Best-effort (VMEM capacity, TensorCore count) query with safe fallbacks."""
    vmem_cap = 128 * 1024 * 1024
    n_cores = 1
    try:
        info = pltpu.get_tpu_info()
        vmem_cap = int(getattr(info, "vmem_capacity_bytes", vmem_cap))
        for attr in ("num_cores", "core_count", "tensorcore_count", "num_tensorcores"):
            val = getattr(info, attr, None)
            if val:
                n_cores = int(val)
                break
    except Exception:
        pass
    return max(32 * 1024 * 1024, vmem_cap), max(1, n_cores)


def _suf_loss_kernel(p_ref, lbl_ref, ftl_ref, fl_ref, ftl_acc, fl_acc, *,
                     delta, gamma, common_class_index, spatial_size,
                     tiles_total, tiles_per_split, block_spatial,
                     need_mask, need_skip):
    sp = pl.program_id(0)          # split (parallel across TensorCores on megacore)
    bi = pl.program_id(1)          # batch block
    j = pl.program_id(2)           # spatial tile within this split
    nb = pl.num_programs(1)
    nj = pl.num_programs(2)

    @pl.when(jnp.logical_and(bi == 0, j == 0))
    def _():
        ftl_acc[...] = jnp.zeros_like(ftl_acc)
        fl_acc[...] = jnp.zeros_like(fl_acc)

    tile_idx = sp * tiles_per_split + j    # un-clamped global spatial tile index

    def _compute_and_accumulate():
        p = p_ref[...].astype(jnp.float32)          # (bb, C, TS), lane-dense spatial
        lbl = lbl_ref[...]                          # (bb, 1, TS) int32 labels
        bb, c, ts = p.shape

        row = lax.broadcasted_iota(jnp.int32, (bb, c, ts), 1)
        eq = row == lbl                             # one-hot ground-truth mask
        pg = jnp.where(eq, p, 0.0)                  # p * g without a cast+mul

        # Element-wise symmetric Focal Tversky (reduction='none' in the spec):
        #   t = (p*g + s) / (delta*g + (1-delta)*p + s)
        num = pg + _EPSILON
        den = jnp.where(eq, delta, 0.0) + (1.0 - delta) * p + _EPSILON
        inv = pl.reciprocal(den, approx=True)
        inv = inv * (2.0 - den * inv)               # one Newton step (VPU slack)
        one_mt = jnp.maximum(1.0 - num * inv, 0.0)  # clamp recip noise at t ~ 1
        ftl_elem = one_mt * jnp.power(one_mt + _EPSILON, -gamma)

        # Symmetric Focal (CE) term, per pixel: only the true class contributes.
        p_true = jnp.sum(pg, axis=1, keepdims=True)          # (bb, 1, TS)
        is_common = lbl == common_class_index
        coef = jnp.where(is_common, 1.0 - delta, delta)
        base = jnp.where(is_common, 1.0 - p_true + _EPSILON, 1.0 - p_true)
        fl_elem = coef * jnp.power(base, gamma) * (-jnp.log(p_true + _EPSILON))

        # Reduce class (sublane, XLU) and folded-batch axes inside the step.
        ftl_red = jnp.sum(jnp.sum(ftl_elem, axis=1, keepdims=True), axis=0)  # (1, TS)
        fl_red = jnp.sum(fl_elem, axis=0)                                    # (1, TS)

        if need_mask:
            # Ragged last spatial tile: mask invalid lanes after the reduction
            # (lane-wise reductions never mix valid and invalid lanes).
            lane = lax.broadcasted_iota(jnp.int32, (1, ts), 1)
            valid = tile_idx * block_spatial + lane < spatial_size
            ftl_red = jnp.where(valid, ftl_red, 0.0)
            fl_red = jnp.where(valid, fl_red, 0.0)

        ftl_acc[...] += ftl_red
        fl_acc[...] += fl_red

    if need_skip:
        # Skip clamped duplicate tiles entirely (scalar guard, no wasted EUP/VALU work).
        pl.when(tile_idx < tiles_total)(_compute_and_accumulate)
    else:
        _compute_and_accumulate()

    @pl.when(jnp.logical_and(bi == nb - 1, j == nj - 1))
    def _():
        ftl_ref[...] = jnp.sum(ftl_acc[...], axis=1, keepdims=True)
        fl_ref[...] = jnp.sum(fl_acc[...], axis=1, keepdims=True)


def symmetric_unified_focal_loss(y_pred, y_true, *, weight=0.5, delta=0.7,
                                 gamma=0.75, common_class_index=0,
                                 block_spatial=None, num_splits=None):
    """Pallas implementation of SymmetricUnifiedFocalLoss.forward (NCHW... probs)."""
    b, c = int(y_pred.shape[0]), int(y_pred.shape[1])
    s_total = 1
    for d in y_pred.shape[2:]:
        s_total *= int(d)
    n = b * s_total

    vmem_cap, n_cores = _tpu_hw_defaults()
    if num_splits is None:
        num_splits = n_cores

    # Free, contiguous views: class axis on sublanes, spatial axis on lanes.
    # No dtype widening on the host (cast happens on the VMEM block in-kernel).
    p = y_pred.reshape(b, c, s_total)
    lbl = y_true.reshape(b, 1, s_total)
    if lbl.dtype != jnp.int32:
        lbl = lbl.astype(jnp.int32)

    # ---- tile sizing from a per-generation VMEM budget -------------------------------
    itemsize_p = jnp.dtype(y_pred.dtype).itemsize
    # Per-spatial-lane working set: double-buffered input blocks + ~12 live (C, TS) f32
    # elementwise intermediates + label block + (1, TS) accumulators/temps.
    per_lane = 2 * c * itemsize_p + 2 * 4 + (12 * c + 8) * 4
    budget = max(8 << 20, min(vmem_cap // 3, 40 << 20))     # ~21 MiB on v7x, 40 MiB else
    lanes_budget = max(128, budget // per_lane)

    if block_spatial is not None:
        ts = s_total if block_spatial >= s_total else max(128, (block_spatial // 128) * 128)
        bb = 1
    elif s_total <= lanes_budget:
        ts = s_total                                        # full spatial row per block
        bb_max = int(max(1, min(b, lanes_budget // max(1, s_total))))
        bb = 1
        for cand in range(bb_max, 0, -1):                   # largest divisor of b <= bb_max
            if b % cand == 0:
                bb = cand
                break
    else:
        ts = min(65536, (lanes_budget // 128) * 128)
        bb = 1

    n_batch_blocks = b // bb
    tiles_total = -(-s_total // ts)
    num_splits = max(1, min(int(num_splits), tiles_total))
    tiles_per_split = -(-tiles_total // num_splits)
    clamp = num_splits * tiles_per_split != tiles_total
    ragged = tiles_total * ts != s_total

    def data_index(sp, bi, j):
        t = sp * tiles_per_split + j
        if clamp:
            t = jnp.minimum(t, tiles_total - 1)
        return (bi, 0, t)

    kernel = functools.partial(
        _suf_loss_kernel,
        delta=float(delta), gamma=float(gamma),
        common_class_index=int(common_class_index),
        spatial_size=int(s_total), tiles_total=int(tiles_total),
        tiles_per_split=int(tiles_per_split), block_spatial=int(ts),
        need_mask=bool(ragged), need_skip=bool(clamp),
    )

    vmem_limit = int(max(32 << 20, min(vmem_cap - (8 << 20), 112 << 20)))

    ftl_part, fl_part = pl.pallas_call(
        kernel,
        out_shape=(jax.ShapeDtypeStruct((num_splits, 1, 1), jnp.float32),
                   jax.ShapeDtypeStruct((num_splits, 1, 1), jnp.float32)),
        grid_spec=pltpu.PrefetchScalarGridSpec(
            num_scalar_prefetch=0,
            grid=(num_splits, n_batch_blocks, tiles_per_split),
            in_specs=[
                pl.BlockSpec((bb, c, ts), data_index),
                pl.BlockSpec((bb, 1, ts), data_index),
            ],
            out_specs=[
                pl.BlockSpec((None, 1, 1), lambda sp, bi, j: (sp, 0, 0)),
                pl.BlockSpec((None, 1, 1), lambda sp, bi, j: (sp, 0, 0)),
            ],
            scratch_shapes=[
                pltpu.VMEM((1, ts), jnp.float32),
                pltpu.VMEM((1, ts), jnp.float32),
            ],
        ),
        compiler_params=pltpu.CompilerParams(
            dimension_semantics=("parallel", "arbitrary", "arbitrary"),
            vmem_limit_bytes=vmem_limit),
    )(p, lbl)

    ftl_sum = jnp.sum(ftl_part)
    fl_sum = jnp.sum(fl_part)
    symmetric_ftl = ftl_sum / (n * c)     # torch.mean over all (N, C) elements
    symmetric_fl = fl_sum / n             # torch.mean over N of per-pixel class sums
    if weight is None:
        return symmetric_ftl + symmetric_fl
    return weight * symmetric_ftl + (1.0 - weight) * symmetric_fl


def _reference_loss(y_pred, y_true, *, weight=0.5, delta=0.7, gamma=0.75,
                    common_class_index=0):
    """Pure-JAX reference mirroring the PyTorch module, for validation."""
    b, c, h, w = y_pred.shape
    n = b * h * w
    p = jnp.transpose(y_pred, (0, 2, 3, 1)).reshape(n, c).astype(jnp.float32)
    g = jax.nn.one_hot(y_true.reshape(n), c, dtype=jnp.float32)

    tp, fn, fp = p * g, (1.0 - p) * g, p * (1.0 - g)
    tversky = (tp + _EPSILON) / (tp + delta * fn + (1.0 - delta) * fp + _EPSILON)
    ftl = jnp.mean((1.0 - tversky) * jnp.power(1.0 - tversky + _EPSILON, -gamma))

    ce = -g * jnp.log(p + _EPSILON)
    col = jnp.arange(c)[None, :]
    is_back = col == common_class_index
    wgt = jnp.where(is_back,
                    (1.0 - delta) * jnp.power(1.0 - p + _EPSILON, gamma),
                    delta * jnp.power(1.0 - p, gamma))
    fl = jnp.mean(jnp.sum(wgt * ce, axis=1))
    return weight * ftl + (1.0 - weight) * fl


if __name__ == "__main__":
    key = jax.random.PRNGKey(0)

    # Primary case: B=2, C=4, 16x16 spatial (whole problem folds into ONE grid step).
    k1, k2 = jax.random.split(key)
    B, C, H, W = 2, 4, 16, 16
    logits = jax.random.normal(k1, (B, C, H, W), dtype=jnp.float32)
    y_pred = jax.nn.softmax(logits, axis=1)                      # probabilities, NCHW
    y_true = jax.random.randint(k2, (B, H, W), 0, C, dtype=jnp.int32)

    loss = jax.block_until_ready(symmetric_unified_focal_loss(y_pred, y_true))
    ref = jax.block_until_ready(_reference_loss(y_pred, y_true))
    assert jnp.allclose(loss, ref, rtol=1e-5, atol=1e-5), (loss, ref)

    # Secondary case exercising ragged-tile masking + split clamp/skip (17x17, TS=128).
    k3, k4 = jax.random.split(k2)
    B2, C2, H2, W2 = 2, 4, 17, 17
    logits2 = jax.random.normal(k3, (B2, C2, H2, W2), dtype=jnp.float32)
    y_pred2 = jax.nn.softmax(logits2, axis=1)
    y_true2 = jax.random.randint(k4, (B2, H2, W2), 0, C2, dtype=jnp.int32)

    loss2 = jax.block_until_ready(
        symmetric_unified_focal_loss(y_pred2, y_true2, block_spatial=128, num_splits=2))
    ref2 = jax.block_until_ready(_reference_loss(y_pred2, y_true2))
    assert jnp.allclose(loss2, ref2, rtol=1e-5, atol=1e-5), (loss2, ref2)

    print("KERNEL_OK")
</pallas_src>

<mosaic_0001>
module attributes {stable_mosaic.version = 11 : i64} {
  func.func @_suf_loss_kernel(%arg0: i32, %arg1: i32, %arg2: i32, %arg3: memref<2x4x256xf32, #tpu.memory_space<vmem>>, %arg4: memref<2x1x256xi32, #tpu.memory_space<vmem>>, %arg5: memref<1x1x1xf32, #tpu.memory_space<vmem>>, %arg6: memref<1x1x1xf32, #tpu.memory_space<vmem>>, %arg7: memref<1x256xf32, #tpu.memory_space<vmem>>, %arg8: memref<1x256xf32, #tpu.memory_space<vmem>>) attributes {dimension_semantics = [#tpu.dimension_semantics<parallel>, #tpu.dimension_semantics<arbitrary>, #tpu.dimension_semantics<arbitrary>], iteration_bounds = array<i64: 1, 1, 1>, scalar_prefetch = 0 : i64, scratch_operands = 2 : i64, tpu.core_type = #tpu.core_type<tc>, window_params = [{transform_indices = @transform_0, window_bounds = array<i64: 2, 4, 256>}, {transform_indices = @transform_1, window_bounds = array<i64: 2, 1, 256>}, {transform_indices = @transform_2, window_bounds = array<i64: 1, 1, 1>}, {transform_indices = @transform_3, window_bounds = array<i64: 1, 1, 1>}]} {
    %c0_i32 = arith.constant 0 : i32
    %0 = arith.cmpi eq, %arg1, %c0_i32 : i32
    %c0_i32_0 = arith.constant 0 : i32
    %1 = arith.cmpi eq, %arg2, %c0_i32_0 : i32
    %2 = arith.andi %0, %1 : i1
    %3 = arith.extui %2 : i1 to i32
    %c0_i32_1 = arith.constant 0 : i32
    %4 = arith.cmpi ne, %3, %c0_i32_1 : i32
    scf.if %4 {
      %cst_41 = arith.constant 0.000000e+00 : f32
      %75 = vector.broadcast %cst_41 : f32 to vector<1x256xf32>
      %c0_42 = arith.constant 0 : index
      %c0_43 = arith.constant 0 : index
      %76 = vector.load %arg7[%c0_42, %c0_43] : memref<1x256xf32, #tpu.memory_space<vmem>>, vector<1x256xf32>
      tpu.vector_store %arg7[%c0_42, %c0_43], %75 {strides = array<i32>} : memref<1x256xf32, #tpu.memory_space<vmem>>, vector<1x256xf32>,
      %cst_44 = arith.constant 0.000000e+00 : f32
      %77 = vector.broadcast %cst_44 : f32 to vector<1x256xf32>
      %c0_45 = arith.constant 0 : index
      %c0_46 = arith.constant 0 : index
      %78 = vector.load %arg8[%c0_45, %c0_46] : memref<1x256xf32, #tpu.memory_space<vmem>>, vector<1x256xf32>
      tpu.vector_store %arg8[%c0_45, %c0_46], %77 {strides = array<i32>} : memref<1x256xf32, #tpu.memory_space<vmem>>, vector<1x256xf32>,
    } else {
    }
    %c0 = arith.constant 0 : index
    %c0_2 = arith.constant 0 : index
    %c0_3 = arith.constant 0 : index
    %5 = vector.load %arg3[%c0, %c0_2, %c0_3] : memref<2x4x256xf32, #tpu.memory_space<vmem>>, vector<2x4x256xf32>
    %c0_4 = arith.constant 0 : index
    %c0_5 = arith.constant 0 : index
    %c0_6 = arith.constant 0 : index
    %6 = vector.load %arg4[%c0_4, %c0_5, %c0_6] : memref<2x1x256xi32, #tpu.memory_space<vmem>>, vector<2x1x256xi32>
    %7 = tpu.iota {dimensions = array<i32: 1>} : vector<2x4x256xi32>
    %8 = vector.broadcast %6 : vector<2x1x256xi32> to vector<2x4x256xi32>
    %9 = arith.cmpi eq, %7, %8 : vector<2x4x256xi32>
    %cst = arith.constant 0.000000e+00 : f32
    %10 = vector.broadcast %cst : f32 to vector<2x4x256xf32>
    %11 = arith.select %9, %5, %10 : vector<2x4x256xi1>, vector<2x4x256xf32>
    %cst_7 = arith.constant 9.99999993E-9 : f32
    %12 = vector.broadcast %cst_7 : f32 to vector<2x4x256xf32>
    %13 = arith.addf %11, %12 : vector<2x4x256xf32>
    %cst_8 = arith.constant 0.699999988 : f32
    %cst_9 = arith.constant 0.000000e+00 : f32
    %14 = vector.broadcast %cst_8 : f32 to vector<2x4x256xf32>
    %15 = vector.broadcast %cst_9 : f32 to vector<2x4x256xf32>
    %16 = arith.select %9, %14, %15 : vector<2x4x256xi1>, vector<2x4x256xf32>
    %cst_10 = arith.constant 3.000000e-01 : f32
    %17 = vector.broadcast %cst_10 : f32 to vector<2x4x256xf32>
    %18 = arith.mulf %17, %5 : vector<2x4x256xf32>
    %19 = arith.addf %16, %18 : vector<2x4x256xf32>
    %cst_11 = arith.constant 9.99999993E-9 : f32
    %20 = vector.broadcast %cst_11 : f32 to vector<2x4x256xf32>
    %21 = arith.addf %19, %20 : vector<2x4x256xf32>
    %22 = tpu.reciprocal %21 {approx = true} : vector<2x4x256xf32> -> vector<2x4x256xf32>
    %23 = arith.mulf %21, %22 : vector<2x4x256xf32>
    %cst_12 = arith.constant 2.000000e+00 : f32
    %24 = vector.broadcast %cst_12 : f32 to vector<2x4x256xf32>
    %25 = arith.subf %24, %23 : vector<2x4x256xf32>
    %26 = arith.mulf %22, %25 : vector<2x4x256xf32>
    %27 = arith.mulf %13, %26 : vector<2x4x256xf32>
    %cst_13 = arith.constant 1.000000e+00 : f32
    %28 = vector.broadcast %cst_13 : f32 to vector<2x4x256xf32>
    %29 = arith.subf %28, %27 : vector<2x4x256xf32>
    %cst_14 = arith.constant 0.000000e+00 : f32
    %30 = vector.broadcast %cst_14 : f32 to vector<2x4x256xf32>
    %31 = arith.maximumf %29, %30 : vector<2x4x256xf32>
    %cst_15 = arith.constant 9.99999993E-9 : f32
    %32 = vector.broadcast %cst_15 : f32 to vector<2x4x256xf32>
    %33 = arith.addf %31, %32 : vector<2x4x256xf32>
    %cst_16 = arith.constant -7.500000e-01 : f32
    %34 = vector.broadcast %cst_16 : f32 to vector<2x4x256xf32>
    %35 = math.powf %33, %34 : vector<2x4x256xf32>
    %36 = arith.mulf %31, %35 : vector<2x4x256xf32>
    %cst_17 = arith.constant dense<0.000000e+00> : vector<2x256xf32>
    %37 = vector.multi_reduction <add>, %11, %cst_17 [1] : vector<2x4x256xf32> to vector<2x256xf32>
    %38 = vector.shape_cast %37 : vector<2x256xf32> to vector<2x1x256xf32>
    %c0_i32_18 = arith.constant 0 : i32
    %39 = vector.broadcast %c0_i32_18 : i32 to vector<2x1x256xi32>
    %40 = arith.cmpi eq, %6, %39 : vector<2x1x256xi32>
    %cst_19 = arith.constant 3.000000e-01 : f32
    %cst_20 = arith.constant 0.699999988 : f32
    %41 = vector.broadcast %cst_19 : f32 to vector<2x1x256xf32>
    %42 = vector.broadcast %cst_20 : f32 to vector<2x1x256xf32>
    %43 = arith.select %40, %41, %42 : vector<2x1x256xi1>, vector<2x1x256xf32>
    %cst_21 = arith.constant 1.000000e+00 : f32
    %44 = vector.broadcast %cst_21 : f32 to vector<2x1x256xf32>
    %45 = arith.subf %44, %38 : vector<2x1x256xf32>
    %cst_22 = arith.constant 9.99999993E-9 : f32
    %46 = vector.broadcast %cst_22 : f32 to vector<2x1x256xf32>
    %47 = arith.addf %45, %46 : vector<2x1x256xf32>
    %cst_23 = arith.constant 1.000000e+00 : f32
    %48 = vector.broadcast %cst_23 : f32 to vector<2x1x256xf32>
    %49 = arith.subf %48, %38 : vector<2x1x256xf32>
    %50 = arith.select %40, %47, %49 : vector<2x1x256xi1>, vector<2x1x256xf32>
    %cst_24 = arith.constant 7.500000e-01 : f32
    %51 = vector.broadcast %cst_24 : f32 to vector<2x1x256xf32>
    %52 = math.powf %50, %51 : vector<2x1x256xf32>
    %53 = arith.mulf %43, %52 : vector<2x1x256xf32>
    %cst_25 = arith.constant 9.99999993E-9 : f32
    %54 = vector.broadcast %cst_25 : f32 to vector<2x1x256xf32>
    %55 = arith.addf %38, %54 : vector<2x1x256xf32>
    %56 = math.log %55 : vector<2x1x256xf32>
    %cst_26 = arith.constant 0.000000e+00 : f32
    %57 = vector.broadcast %cst_26 : f32 to vector<2x1x256xf32>
    %58 = arith.subf %57, %56 : vector<2x1x256xf32>
    %59 = arith.mulf %53, %58 : vector<2x1x256xf32>
    %cst_27 = arith.constant dense<0.000000e+00> : vector<2x256xf32>
    %60 = vector.multi_reduction <add>, %36, %cst_27 [1] : vector<2x4x256xf32> to vector<2x256xf32>
    %61 = vector.shape_cast %60 : vector<2x256xf32> to vector<2x1x256xf32>
    %cst_28 = arith.constant dense<0.000000e+00> : vector<1x256xf32>
    %62 = vector.multi_reduction <add>, %61, %cst_28 [0] : vector<2x1x256xf32> to vector<1x256xf32>
    %cst_29 = arith.constant dense<0.000000e+00> : vector<1x256xf32>
    %63 = vector.multi_reduction <add>, %59, %cst_29 [0] : vector<2x1x256xf32> to vector<1x256xf32>
    %c0_30 = arith.constant 0 : index
    %c0_31 = arith.constant 0 : index
    %64 = vector.load %arg7[%c0_30, %c0_31] : memref<1x256xf32, #tpu.memory_space<vmem>>, vector<1x256xf32>
    %65 = arith.addf %64, %62 : vector<1x256xf32>
    %c0_32 = arith.constant 0 : index
    %c0_33 = arith.constant 0 : index
    %66 = vector.load %arg7[%c0_32, %c0_33] : memref<1x256xf32, #tpu.memory_space<vmem>>, vector<1x256xf32>
    tpu.vector_store %arg7[%c0_32, %c0_33], %65 {strides = array<i32>} : memref<1x256xf32, #tpu.memory_space<vmem>>, vector<1x256xf32>,
    %c0_34 = arith.constant 0 : index
    %c0_35 = arith.constant 0 : index
    %67 = vector.load %arg8[%c0_34, %c0_35] : memref<1x256xf32, #tpu.memory_space<vmem>>, vector<1x256xf32>
    %68 = arith.addf %67, %63 : vector<1x256xf32>
    %c0_36 = arith.constant 0 : index
    %c0_37 = arith.constant 0 : index
    %69 = vector.load %arg8[%c0_36, %c0_37] : memref<1x256xf32, #tpu.memory_space<vmem>>, vector<1x256xf32>
    tpu.vector_store %arg8[%c0_36, %c0_37], %68 {strides = array<i32>} : memref<1x256xf32, #tpu.memory_space<vmem>>, vector<1x256xf32>,
    %c0_i32_38 = arith.constant 0 : i32
    %70 = arith.cmpi eq, %arg1, %c0_i32_38 : i32
    %c0_i32_39 = arith.constant 0 : i32
    %71 = arith.cmpi eq, %arg2, %c0_i32_39 : i32
    %72 = arith.andi %70, %71 : i1
    %73 = arith.extui %72 : i1 to i32
    %c0_i32_40 = arith.constant 0 : i32
    %74 = arith.cmpi ne, %73, %c0_i32_40 : i32
    scf.if %74 {
      %c0_41 = arith.constant 0 : index
      %c0_42 = arith.constant 0 : index
      %75 = vector.load %arg7[%c0_41, %c0_42] : memref<1x256xf32, #tpu.memory_space<vmem>>, vector<1x256xf32>
      %cst_43 = arith.constant dense<0.000000e+00> : vector<1xf32>
      %76 = vector.multi_reduction <add>, %75, %cst_43 [1] : vector<1x256xf32> to vector<1xf32>
      %77 = vector.shape_cast %76 : vector<1xf32> to vector<1x1xf32>
      %c0_44 = arith.constant 0 : index
      %c0_45 = arith.constant 0 : index
      %c0_46 = arith.constant 0 : index
      %78 = vector.load %arg5[%c0_44, %c0_45, %c0_46] : memref<1x1x1xf32, #tpu.memory_space<vmem>>, vector<1x1x1xf32>
      %79 = vector.shape_cast %78 : vector<1x1x1xf32> to vector<1x1xf32>
      %80 = vector.shape_cast %77 : vector<1x1xf32> to vector<1x1x1xf32>
      tpu.vector_store %arg5[%c0_44, %c0_45, %c0_46], %80 {strides = array<i32>} : memref<1x1x1xf32, #tpu.memory_space<vmem>>, vector<1x1x1xf32>,
      %c0_47 = arith.constant 0 : index
      %c0_48 = arith.constant 0 : index
      %81 = vector.load %arg8[%c0_47, %c0_48] : memref<1x256xf32, #tpu.memory_space<vmem>>, vector<1x256xf32>
      %cst_49 = arith.constant dense<0.000000e+00> : vector<1xf32>
      %82 = vector.multi_reduction <add>, %81, %cst_49 [1] : vector<1x256xf32> to vector<1xf32>
      %83 = vector.shape_cast %82 : vector<1xf32> to vector<1x1xf32>
      %c0_50 = arith.constant 0 : index
      %c0_51 = arith.constant 0 : index
      %c0_52 = arith.constant 0 : index
      %84 = vector.load %arg6[%c0_50, %c0_51, %c0_52] : memref<1x1x1xf32, #tpu.memory_space<vmem>>, vector<1x1x1xf32>
      %85 = vector.shape_cast %84 : vector<1x1x1xf32> to vector<1x1xf32>
      %86 = vector.shape_cast %83 : vector<1x1xf32> to vector<1x1x1xf32>
      tpu.vector_store %arg6[%c0_50, %c0_51, %c0_52], %86 {strides = array<i32>} : memref<1x1x1xf32, #tpu.memory_space<vmem>>, vector<1x1x1xf32>,
    } else {
    }
    return
  }
  func.func @transform_0(%arg0: i32, %arg1: i32, %arg2: i32) -> (i32, i32, i32) {
    %c1_i32 = arith.constant 1 : i32
    %0 = arith.muli %arg0, %c1_i32 : i32
    %1 = arith.addi %0, %arg2 : i32
    %c0_i32 = arith.constant 0 : i32
    %c0_i32_0 = arith.constant 0 : i32
    return %arg1, %c0_i32, %1 : i32, i32, i32
  }
  func.func @transform_1(%arg0: i32, %arg1: i32, %arg2: i32) -> (i32, i32, i32) {
    %c1_i32 = arith.constant 1 : i32
    %0 = arith.muli %arg0, %c1_i32 : i32
    %1 = arith.addi %0, %arg2 : i32
    %c0_i32 = arith.constant 0 : i32
    %c0_i32_0 = arith.constant 0 : i32
    return %arg1, %c0_i32, %1 : i32, i32, i32
  }
  func.func @transform_2(%arg0: i32, %arg1: i32, %arg2: i32) -> (i32, i32, i32) {
    %c0_i32 = arith.constant 0 : i32
    %c0_i32_0 = arith.constant 0 : i32
    %c0_i32_1 = arith.constant 0 : i32
    return %arg0, %c0_i32, %c0_i32_0 : i32, i32, i32
  }
  func.func @transform_3(%arg0: i32, %arg1: i32, %arg2: i32) -> (i32, i32, i32) {
    %c0_i32 = arith.constant 0 : i32
    %c0_i32_0 = arith.constant 0 : i32
    %c0_i32_1 = arith.constant 0 : i32
    return %arg0, %c0_i32, %c0_i32_0 : i32, i32, i32
  }
}

</mosaic_0001>

<bundles_post_ra>
// kernel: tpu_custom_call.1
= control target key start
LH: loop header
LB: loop body
LE: loop exit
PB: predicated region body
PF: predicated region fallthrough
CT: control target
= control target key end

     0   :  { %9 = vsyncpa [#allocation5], 0  ;;  %s1060_s0 = inlined_call_operand.hbm [shape: f32[2,4,256], index: 0, kind: input, shape index: {}]   ;;  %s1061_s1 = inlined_call_operand.hbm [shape: s32[2,1,256], index: 1, kind: input, shape index: {}]   ;;  %s1062_s2 = inlined_call_operand.hbm [shape: f32[1,1,1], index: 2, kind: output, shape index: {0}]   ;;  %s1063_s3 = inlined_call_operand.hbm [shape: f32[1,1,1], index: 3, kind: output, shape index: {1}]  }
   0x1   :  { %10 = vsyncpa [#allocation8], 0 }
   0x2   :  { %11 = vsyncpa [#allocation6], 0 }
   0x3   :  { %12 = vsyncpa [#allocation11], 0  ;;  %s747_s12 = smov [#allocation4]   ;;  %s651_s16 = scalar_lea.hbm %s1060_s0, 256 }
   0x4   :  { %s22_s13 = sshll.u32 %s747_s12, 4  ;;  %p652_p0 = scmp.ne.s32.totalorder %s1060_s0, %s651_s16  ;;  %s23_s13 = int_to_ptr.vmem [resolvable:$true] %s22_s13 }
   0x5   :  { %p655_p1 = scmp.lt.u32.totalorder %s651_s16, %s1060_s0 }
   0x7   :  { %p657_p2 = pnand %p655_p1, %p652_p0 }
   0x9   :  { %660 = shalt.err (!%p657_p2)
}
   0xa   :  { %s661_s21 = scalar_lea.vmem %s23_s13, 256  ;;  %p666_p4 = scmp.lt.s32.totalorder %s23_s13, %s23_s13 }
   0xb   :  { %p662_p3 = scmp.ne.s32.totalorder %s23_s13, %s661_s21  ;;  %p667_p5 = scmp.lt.s32.totalorder %s661_s21, %s661_s21 }
   0xd   :  { %p668_p6 = por %p667_p5, %p666_p4 }
   0xf   :  { %p669_p7 = pnand %p668_p6, %p662_p3 }
  0x11   :  { %672 = shalt.err (!%p669_p7)
}
  0x12   :  { %s748_s22 = smov 128   ;;  %s749_s23 = smov 8  }
  0x13   :  { %28 = dma.hbm_to_vmem [thread:$0]  %s1060_s0, 256, %s23_s13, [#allocation5], %s748_s22, %s748_s22, %s749_s23  }
  0x14   :  { %s750_s26 = smov [#allocation7]   ;;  %s673_s30 = scalar_lea.hbm %s1061_s1, 64 }
  0x15   :  { %s38_s27 = sshll.u32 %s750_s26, 4  ;;  %p674_p8 = scmp.ne.s32.totalorder %s1061_s1, %s673_s30  ;;  %s39_s27 = int_to_ptr.vmem [resolvable:$true] %s38_s27 }
  0x16   :  { %p677_p9 = scmp.lt.u32.totalorder %s673_s30, %s1061_s1 }
  0x18   :  { %p679_p10 = pnand %p677_p9, %p674_p8 }
  0x1a   :  { %682 = shalt.err (!%p679_p10)
}
  0x1b   :  { %s683_s8 = scalar_lea.vmem %s39_s27, 64  ;;  %p688_p12 = scmp.lt.s32.totalorder %s39_s27, %s39_s27 }
  0x1c   :  { %p684_p11 = scmp.ne.s32.totalorder %s39_s27, %s683_s8  ;;  %p689_p13 = scmp.lt.s32.totalorder %s683_s8, %s683_s8 }
  0x1e   :  { %p690_p0 = por %p689_p13, %p688_p12 }
  0x20   :  { %p691_p1 = pnand %p690_p0, %p684_p11 }
  0x22   :  { %694 = shalt.err (!%p691_p1)
}
  0x23   :  { %s751_s0 = smov 32   ;;  %s752_s9 = smov 2  }
  0x24   :  { %44 = dma.hbm_to_vmem [thread:$0]  %s1061_s1, 64, %s39_s27, [#allocation8], %s751_s0, %s751_s0, %s752_s9  }
  0x25   :  { %739 = dma.done.wait [#allocation5], 256  }
  0x26   :  { %740 = vsyncadd [#allocation5], 4294967040 }
  0x27   :  { %741 = dma.done.wait [#allocation8], 64  }
  0x28   :  { %742 = vsyncadd [#allocation8], 4294967232  ;;  %v61_v0 = vlaneseq  ;;  %v753_v3 = vmov 0.0   ;;  %v67_v6 = vld [vmem:[#allocation4] sm:$0xff]  ;;  %v68_v7 = vld [vmem:[#allocation4 + $0x8] sm:$0xff]  ;;  %vm1065_vm5 = vcmask 1043456  }
  0x29   :  { %v818_v8 = vld [vmem:[#allocation7] sm:$0x3]  ;;  %v820_v9 = vld [vmem:[#allocation7 + $0x2] sm:$0x3]  ;;  %v95_v12 = vcombine.high %v67_v6, %v67_v6  ;;  %v96_v15 = vcombine.high %v68_v7, %v68_v7  ;;  %v111_v16 = vmul.f32 0.3, %v67_v6 }
  0x2a   :  { %vm802_vm0 = vcmp.lt.s32.totalorder %v61_v0, 256  ;;  %v806_v2 = vshrl.u32 %v61_v0, 7  ;;  %v112_v17 = vmul.f32 0.3, %v68_v7  ;;  %v754_v48 = vmov 1966171168  }
  0x2b   :  { %65 = vst.msk [vmem:[#allocation2] sm:$0x3] %vm802_vm0, %v753_v3  ;;  %66 = vst.msk [vmem:[#allocation3] sm:$0x3] %vm802_vm0, %v753_v3  ;;  %v115_v23 = vcombine.high %v111_v16, %v111_v16  ;;  %v214_v49 = vunpack.c.l.s4 %v754_v48  ;;  %vm196_vm6 = vcmp.eq.s32.totalorder %v818_v8, 0  ;;  %vm1064_vm7 = vcmp.eq.s32.totalorder %v820_v9, 0 }
  0x2c   :  { %v813_v4 = vsub.s32 0, %v806_v2  ;;  %v816_v5 = vsub.s32 1, %v806_v2  ;;  %v116_v27 = vcombine.high %v112_v17, %v112_v17  ;;  %s756_s1 = smov [#allocation9]   ;;  %s757_s13 = smov [#allocation10]  }
  0x2d   :  { %v215_v58 = vunpack.c.0.s8 %v214_v49  ;;  %s490_s12 = sshll.u32 %s756_s1, 4  ;;  %s500_s14 = sshll.u32 %s757_s13, 4  ;;  %s491_s12 = int_to_ptr.vmem [resolvable:$true] %s490_s12  ;;  %s501_s14 = int_to_ptr.vmem [resolvable:$true] %s500_s14 }
  0x2e   :  { %v76_v10 = vrot.slane %v818_v8, %v813_v4  ;;  %v80_v11 = vrot.slane %v818_v8, %v816_v5  ;;  %v84_v13 = vrot.slane %v820_v9, %v813_v4  ;;  %v88_v14 = vrot.slane %v820_v9, %v816_v5  ;;  %s695_s15 = scalar_lea.vmem %s491_s12, 16  ;;  %s699_s16 = scalar_lea.vmem %s491_s12, 32 }
  0x2f   :  { %p696_p2 = scmp.ne.s32.totalorder %s491_s12, %s695_s15  ;;  %p700_p3 = scmp.lt.s32.totalorder %s491_s12, %s491_s12 }
  0x30   :  { %vm89_vm1 = vcmp.eq.s32.totalorder %v806_v2, %v76_v10  ;;  %vm90_vm2 = vcmp.eq.s32.totalorder %v806_v2, %v80_v11  ;;  %vm91_vm3 = vcmp.eq.s32.totalorder %v806_v2, %v84_v13  ;;  %vm92_vm4 = vcmp.eq.s32.totalorder %v806_v2, %v88_v14  ;;  %p701_p4 = scmp.lt.s32.totalorder %s699_s16, %s695_s15 }
  0x31   :  { %v99_v18 = vsel %vm89_vm1, %v67_v6, 0.0  ;;  %v100_v19 = vsel %vm90_vm2, %v95_v12, 0.0  ;;  %v101_v20 = vsel %vm91_vm3, %v68_v7, 0.0  ;;  %v834_v21 = vsel %vm92_vm4, %v96_v15, 0.0 }
  0x32   :  { %v107_v22 = vsel %vm89_vm1, 0.7, %v753_v3  ;;  %v108_v24 = vsel %vm90_vm2, 0.7, %v753_v3  ;;  %v109_v25 = vsel %vm91_vm3, 0.7, %v753_v3  ;;  %v846_v11 = vsub.s32 %v215_v58, %v806_v2  ;;  %p702_p5 = por %p701_p4, %p700_p3 }
  0x33   :  { %v110_v26 = vsel %vm92_vm4, 0.7, %v753_v3  ;;  %v119_v28 = vadd.f32 %v111_v16, %v107_v22  ;;  %v120_v29 = vadd.f32 %v115_v23, %v108_v24  ;;  %v121_v30 = vadd.f32 %v112_v17, %v109_v25 }
  0x34   :  { %v168_v31 = vsel %vm1065_vm5, %v99_v18, 0.0  ;;  %v122_v32 = vadd.f32 %v116_v27, %v110_v26  ;;  %v175_v34 = vsel %vm1065_vm5, %v100_v19, 0.0  ;;  %v182_v35 = vsel %vm1065_vm5, %v101_v20, 0.0  ;;  %p703_p6 = pnand %p702_p5, %p696_p2 }
  0x35   :  { %v169_v33 = vrot.slane %v168_v31, 4  ;;  %v123_v36 = vadd.f32 1e-08, %v119_v28  ;;  %v124_v37 = vadd.f32 1e-08, %v120_v29  ;;  %v176_v41 = vrot.slane %v175_v34, 4 }
  0x36   :  { %v125_v38 = vadd.f32 1e-08, %v121_v30  ;;  %v126_v39 = vadd.f32 1e-08, %v122_v32  ;;  %v183_v42 = vrot.slane %v182_v35, 4  ;;  %v189_v43 = vsel %vm1065_vm5, %v834_v21, 0.0 }
  0x37   :  { %v170_v40 = vadd.f32 %v169_v33, %v168_v31  ;;  %603 = vrcp.f32 %v123_v36  ;;  %v177_v45 = vadd.f32 %v176_v41, %v175_v34  ;;  %v190_v47 = vrot.slane %v189_v43, 4 }
  0x38   :  { %605 = vrcp.f32 %v124_v37  ;;  %v184_v46 = vadd.f32 %v183_v42, %v182_v35  ;;  %v103_v7 = vadd.f32 1e-08, %v99_v18  ;;  %v104_v22 = vadd.f32 1e-08, %v100_v19 }
  0x39   :  { %v171_v44 = vrot.slane %v170_v40, 2  ;;  %607 = vrcp.f32 %v125_v38  ;;  %v178_v51 = vrot.slane %v177_v45, 2  ;;  %v191_v53 = vadd.f32 %v190_v47, %v189_v43 }
  0x3a   :  { %609 = vrcp.f32 %v126_v39  ;;  %v185_v52 = vrot.slane %v184_v46, 2  ;;  %v105_v23 = vadd.f32 1e-08, %v101_v20  ;;  %v106_v18 = vadd.f32 1e-08, %v834_v21 }
  0x3b   :  { %v172_v50 = vadd.f32 %v171_v44, %v170_v40  ;;  %v179_v55 = vadd.f32 %v178_v51, %v177_v45  ;;  %v192_v57 = vrot.slane %v191_v53, 2 }
  0x3c   :  { %v186_v56 = vadd.f32 %v185_v52, %v184_v46 }
  0x3d   :  { %v173_v54 = vrot.slane %v172_v50, 1  ;;  %v180_v60 = vrot.slane %v179_v55, 1  ;;  %v193_v62 = vadd.f32 %v192_v57, %v191_v53 }
  0x3e   :  { %v187_v61 = vrot.slane %v186_v56, 1 }
  0x3f   :  { %v174_v59 = vadd.f32 %v173_v54, %v172_v50  ;;  %v841_v63 = vadd.f32 %v180_v60, %v179_v55  ;;  %v194_v10 = vrot.slane %v193_v62, 1 }
  0x40   :  { %v843_v0 = vadd.f32 %v187_v61, %v186_v56 }
  0x41   :  { %v200_v3 = vsub.f32 1.0, %v174_v59  ;;  %v604_v6 = vpop.eup %603  ;;  %v201_v14 = vsub.f32 1.0, %v841_v63  ;;  %v850_v25 = vadd.f32 %v194_v10, %v193_v62  ;;  %v286_v54 = vadd.f32 1e-08, %v174_v59 }
  0x42   :  { %v606_v12 = vpop.eup %605  ;;  %v131_v13 = vmul.f32 %v604_v6, %v123_v36  ;;  %v202_v15 = vsub.f32 1.0, %v843_v0 }
  0x43   :  { %v204_v16 = vadd.f32 1e-08, %v200_v3  ;;  %v608_v17 = vpop.eup %607  ;;  %v132_v24 = vmul.f32 %v606_v12, %v124_v37  ;;  %v205_v2 = vadd.f32 1e-08, %v201_v14  ;;  %v203_v31 = vsub.f32 1.0, %v850_v25 }
  0x44   :  { %v610_v26 = vpop.eup %609  ;;  %v133_v27 = vmul.f32 %v608_v17, %v125_v38  ;;  %v135_v28 = vsub.f32 2.0, %v131_v13  ;;  %v248_v32 = vcombine.low %v200_v3, %v201_v14  ;;  %v206_v35 = vadd.f32 1e-08, %v202_v15 }
  0x45   :  { %v134_v29 = vmul.f32 %v610_v26, %v126_v39  ;;  %v136_v30 = vsub.f32 2.0, %v132_v24  ;;  %v212_v36 = vcombine.low %v204_v16, %v205_v2  ;;  %v207_v37 = vadd.f32 1e-08, %v203_v31 }
  0x46   :  { %v137_v33 = vsub.f32 2.0, %v133_v27  ;;  %v139_v34 = vmul.f32 %v604_v6, %v135_v28  ;;  %v255_v40 = vrot.slane %v248_v32, %v846_v11  ;;  %v263_v44 = vcombine.low %v202_v15, %v203_v31 }
  0x47   :  { %v138_v19 = vsub.f32 2.0, %v134_v29  ;;  %v140_v20 = vmul.f32 %v606_v12, %v136_v30  ;;  %v219_v21 = vrot.slane %v212_v36, %v846_v11  ;;  %v227_v48 = vcombine.low %v206_v35, %v207_v37 }
  0x48   :  { %v141_v41 = vmul.f32 %v608_v17, %v137_v33  ;;  %v143_v42 = vmul.f32 %v139_v34, %v103_v7  ;;  %v262_v43 = vrot.slane %v255_v40, %v846_v11  ;;  %v270_v61 = vrot.slane %v263_v44, %v846_v11 }
  0x49   :  { %v142_v38 = vmul.f32 %v610_v26, %v138_v19  ;;  %v144_v39 = vmul.f32 %v140_v20, %v104_v22  ;;  %v226_v47 = vrot.slane %v219_v21, %v846_v11  ;;  %v234_v60 = vrot.slane %v227_v48, %v846_v11 }
  0x4a   :  { %v145_v45 = vmul.f32 %v141_v41, %v105_v23  ;;  %v147_v46 = vsub.f32 1.0, %v143_v42  ;;  %v277_v7 = vrot.slane %v270_v61, %v846_v11  ;;  %v287_v13 = vadd.f32 1e-08, %v841_v63 }
  0x4b   :  { %v146_v49 = vmul.f32 %v142_v38, %v106_v18  ;;  %v148_v50 = vsub.f32 1.0, %v144_v39  ;;  %v863_v53 = vsel %vm196_vm6, %v226_v47, %v262_v43  ;;  %v241_v6 = vrot.slane %v234_v60, %v846_v11 }
  0x4c   :  { %v149_v51 = vsub.f32 1.0, %v145_v45  ;;  %v859_v52 = vmax.f32 %v147_v46, 0.0  ;;  %611 = vrsqrt.f32 %v863_v53  ;;  %v288_v14 = vadd.f32 1e-08, %v843_v0 }
  0x4d   :  { %v150_v55 = vsub.f32 1.0, %v146_v49  ;;  %v865_v56 = vmax.f32 %v148_v50, 0.0  ;;  %613 = vlog2.f32 %v286_v54  ;;  %v897_v12 = vsel %vm1064_vm7, %v241_v6, %v277_v7 }
  0x4e   :  { %v867_v57 = vmax.f32 %v149_v51, 0.0  ;;  %v870_v58 = vadd.f32 1e-08, %v859_v52  ;;  %vm564_vm8 = vcmp.eq.f32.partialorder %v863_v53, inf  ;;  %v567_v16 = vand.u32 2147483648, %v863_v53 }
  0x4f   :  { %v874_v62 = vmax.f32 %v150_v55, 0.0  ;;  %v877_v3 = vadd.f32 1e-08, %v865_v56  ;;  %v289_v17 = vadd.f32 1e-08, %v850_v25  ;;  %vm558_vm9 = vcmp.eq.f32.partialorder %v863_v53, 0.0 }
  0x50   :  { %v881_v59 = vadd.f32 1e-08, %v867_v57  ;;  %615 = vrsqrt.f32 %v870_v58  ;;  %v516_v28 = vand.u32 2147483647, %v870_v58  ;;  %v755_v29 = vmov 0.7  }
  0x51   :  { %617 = vrcp.f32 %v870_v58  ;;  %v888_v10 = vadd.f32 1e-08, %v874_v62  ;;  %v916_v30 = vsel %vm196_vm6, 0.3, %v755_v29  ;;  %vm514_vm10 = vcmp.eq.f32.partialorder %v870_v58, 0.0 }
  0x52   :  { %619 = vrsqrt.f32 %v877_v3  ;;  %vm559_vm11 = vcmp.lt.f32.partialorder %v863_v53, 0.0  ;;  %v560_v32 = vand.u32 2147483647, %v863_v53  ;;  %vm515_vm12 = vcmp.lt.f32.partialorder %v870_v58, 0.0 }
  0x53   :  { %621 = vrcp.f32 %v877_v3  ;;  %vm525_vm13 = vcmp.eq.f32.partialorder %v877_v3, 0.0  ;;  %v527_v35 = vand.u32 2147483647, %v877_v3  ;;  %vm924_vm14 = vcmp.eq.f32.partialorder %v516_v28, inf }
  0x54   :  { %623 = vrsqrt.f32 %v881_v59  ;;  %vm526_vm15 = vcmp.lt.f32.partialorder %v877_v3, 0.0  ;;  %vm580_vm1 = vcmp.eq.f32.partialorder %v897_v12, inf  ;;  %v583_v19 = vand.u32 2147483648, %v897_v12 }
  0x55   :  { %625 = vrcp.f32 %v881_v59  ;;  %v538_v37 = vand.u32 2147483647, %v881_v59  ;;  %vm574_vm3 = vcmp.eq.f32.partialorder %v897_v12, 0.0  ;;  %vm537_vm4 = vcmp.lt.f32.partialorder %v881_v59, 0.0 }
  0x56   :  { %627 = vrsqrt.f32 %v888_v10  ;;  %v612_v15 = vpop.eup %611  ;;  %v549_v42 = vand.u32 2147483647, %v888_v10  ;;  %vm937_vm6 = vcmp.eq.f32.partialorder %v527_v35, inf  ;;  %vm548_vm7 = vcmp.lt.f32.partialorder %v888_v10, 0.0 }
  0x57   :  { %629 = vrcp.f32 %v888_v10  ;;  %v614_v22 = vpop.eup %613  ;;  %v563_v63 = vmul.f32 %v612_v15, %v863_v53  ;;  %vm946_vm5 = vcmp.eq.f32.partialorder %v538_v37, inf  ;;  %vm950_vm2 = vcmp.eq.f32.partialorder %v560_v32, inf }
  0x58   :  { %631 = vrsqrt.f32 %v897_v12  ;;  %v291_v33 = vmul.f32 0.6931472, %v614_v22 }
  0x59   :  { %633 = vlog2.f32 %v287_v13  ;;  %v565_v24 = vsel %vm564_vm8, %v863_v53, %v563_v63  ;;  %vm547_vm8 = vcmp.eq.f32.partialorder %v888_v10, 0.0 }
  0x5a   :  { %v616_v23 = vpop.eup %615  ;;  %635 = vlog2.f32 %v288_v14  ;;  %v568_v18 = vsel %vm558_vm9, %v567_v16, %v565_v24  ;;  %v298_v38 = vsub.f32 0.0, %v291_v33 }
  0x5b   :  { %v618_v0 = vpop.eup %617  ;;  %637 = vrsqrt.f32 %v616_v23 }
  0x5c   :  { %v620_v26 = vpop.eup %619  ;;  %639 = vlog2.f32 %v289_v17 }
  0x5d   :  { %v622_v27 = vpop.eup %621  ;;  %641 = vrsqrt.f32 %v620_v26 }
  0x5e   :  { %v624_v25 = vpop.eup %623  ;;  %643 = vrsqrt.f32 %v568_v18 }
  0x5f   :  { %v626_v2 = vpop.eup %625  ;;  %645 = vrsqrt.f32 %v624_v25  ;;  %v576_v25 = vand.u32 2147483647, %v897_v12 }
  0x60   :  { %v628_v31 = vpop.eup %627 }
  0x61   :  { %v630_v34 = vpop.eup %629  ;;  %647 = vrsqrt.f32 %v628_v31 }
  0x62   :  { %v632_v36 = vpop.eup %631 }
  0x63   :  { %v634_v20 = vpop.eup %633  ;;  %v579_v40 = vmul.f32 %v632_v36, %v897_v12 }
  0x64   :  { %v636_v41 = vpop.eup %635  ;;  %v293_v21 = vmul.f32 0.6931472, %v634_v20 }
  0x65   :  { %v638_v39 = vpop.eup %637  ;;  %v581_v44 = vsel %vm580_vm1, %v897_v12, %v579_v40  ;;  %v295_v45 = vmul.f32 0.6931472, %v636_v41  ;;  %vm956_vm1 = vcmp.eq.f32.partialorder %v549_v42, inf }
  0x66   :  { %v640_v46 = vpop.eup %639  ;;  %v521_v47 = vmul.f32 %v638_v39, %v618_v0  ;;  %v584_v48 = vsel %vm574_vm3, %v583_v19, %v581_v44  ;;  %v299_v49 = vsub.f32 0.0, %v293_v21 }
  0x67   :  { %v642_v50 = vpop.eup %641  ;;  %649 = vrsqrt.f32 %v584_v48  ;;  %v297_v55 = vmul.f32 0.6931472, %v640_v46  ;;  %v300_v17 = vsub.f32 0.0, %v295_v45 }
  0x68   :  { %v644_v60 = vpop.eup %643  ;;  %v522_v61 = vsel %vm515_vm12, nan, %v521_v47  ;;  %v532_v6 = vmul.f32 %v642_v50, %v622_v27  ;;  %v306_v13 = vcombine.low %v298_v38, %v299_v49  ;;  %vm1082_vm12 = vcmp.eq.s32.totalorder %v820_v9, 0 }
  0x69   :  { %v646_v14 = vpop.eup %645  ;;  %v523_v15 = vsel %vm514_vm10, inf, %v522_v61  ;;  %v570_v16 = vmul.f32 %v644_v60, %v863_v53  ;;  %v301_v22 = vsub.f32 0.0, %v297_v55  ;;  %vm1078_vm10 = vcmp.eq.f32.partialorder %v881_v59, 0.0 }
  0x6a   :  { %v524_v63 = vsel %vm924_vm14, 0.0, %v523_v15  ;;  %v533_v23 = vsel %vm526_vm15, nan, %v532_v6  ;;  %v543_v0 = vmul.f32 %v646_v14, %v626_v2  ;;  %v313_v24 = vrot.slane %v306_v13, %v846_v11 }
  0x6b   :  { %v648_v26 = vpop.eup %647  ;;  %v534_v18 = vsel %vm525_vm13, inf, %v533_v23  ;;  %v163_v58 = vmul.f32 %v524_v63, %v859_v52  ;;  %v571_v27 = vsel %vm559_vm11, nan, %v570_v16  ;;  %v321_v35 = vcombine.low %v300_v17, %v301_v22 }
  0x6c   :  { %v535_v28 = vsel %vm937_vm6, 0.0, %v534_v18  ;;  %v544_v31 = vsel %vm537_vm4, nan, %v543_v0  ;;  %v554_v2 = vmul.f32 %v648_v26, %v630_v34  ;;  %v572_v32 = vsel %vm558_vm9, 0.0, %v571_v27 }
  0x6d   :  { %v545_v3 = vsel %vm1078_vm10, inf, %v544_v31  ;;  %v164_v52 = vmul.f32 %v535_v28, %v865_v56  ;;  %v573_v33 = vsel %vm950_vm2, inf, %v572_v32  ;;  %v320_v53 = vrot.slane %v313_v24, %v846_v11 }
  0x6e   :  { %v546_v36 = vsel %vm946_vm5, 0.0, %v545_v3  ;;  %v555_v8 = vsel %vm548_vm7, nan, %v554_v2  ;;  %v284_v34 = vmul.f32 %v573_v33, %v916_v30  ;;  %vm1079_vm9 = vcmask 1043456  }
  0x6f   :  { %v556_v59 = vsel %vm547_vm8, inf, %v555_v8  ;;  %v165_v19 = vmul.f32 %v546_v36, %v867_v57  ;;  %v340_v56 = vsel %vm1079_vm9, %v163_v58, 0.0  ;;  %vm1080_vm11 = vmmov %vm1079_vm9  ;;  %vm575_vm5 = vcmp.lt.f32.partialorder %v897_v12, 0.0 }
  0x70   :  { %v347_v20 = vsel %vm1080_vm11, %v164_v52, 0.0  ;;  %v557_v37 = vsel %vm956_vm1, 0.0, %v556_v59  ;;  %v341_v40 = vrot.slane %v340_v56, 4  ;;  %v328_v42 = vrot.slane %v321_v35, %v846_v11  ;;  %vm1081_vm7 = vmmov %vm1079_vm9 }
  0x71   :  { %v650_v41 = vpop.eup %649  ;;  %v166_v30 = vmul.f32 %v557_v37, %v874_v62  ;;  %v348_v21 = vrot.slane %v347_v20, 4  ;;  %v354_v10 = vsel %vm1081_vm7, %v165_v19, 0.0  ;;  %v199_v57 = vsel %vm1082_vm12, 0.3, %v755_v29  ;;  %vm1083_vm14 = vmmov %vm1081_vm7  ;;  %v399_v19 = vld [vmem:[#allocation2] sm:$0x3] }
  0x72   :  { %v586_v38 = vmul.f32 %v650_v41, %v897_v12  ;;  %v342_v39 = vadd.f32 %v341_v40, %v340_v56  ;;  %v355_v43 = vrot.slane %v354_v10, 4  ;;  %vm577_vm13 = vcmp.eq.f32.partialorder %v576_v25, inf }
  0x73   :  { %v338_v44 = vmul.f32 %v320_v53, %v284_v34  ;;  %v349_v45 = vadd.f32 %v348_v21, %v347_v20  ;;  %v361_v46 = vsel %vm1083_vm14, %v166_v30, 0.0  ;;  %v335_v51 = vrot.slane %v328_v42, %v846_v11  ;;  %v424_v34 = vld [vmem:[#allocation3] sm:$0x3] }
  0x74   :  { %v587_v47 = vsel %vm575_vm5, nan, %v586_v38  ;;  %v343_v62 = vrot.slane %v342_v39, 2  ;;  %v356_v48 = vadd.f32 %v355_v43, %v354_v10  ;;  %v362_v49 = vrot.slane %v361_v46, 4 }
  0x75   :  { %v588_v50 = vsel %vm574_vm3, 0.0, %v587_v47  ;;  %v350_v9 = vrot.slane %v349_v45, 2  ;;  %v375_v7 = vrot.slane %v338_v44, %v813_v4  ;;  %v379_v13 = vrot.slane %v338_v44, %v816_v5 }
  0x76   :  { %v589_v29 = vsel %vm577_vm13, inf, %v588_v50  ;;  %v344_v54 = vadd.f32 %v343_v62, %v342_v39  ;;  %v357_v55 = vrot.slane %v356_v48, 2  ;;  %v363_v60 = vadd.f32 %v362_v49, %v361_v46 }
  0x77   :  { %v285_v61 = vmul.f32 %v589_v29, %v199_v57  ;;  %v351_v6 = vadd.f32 %v350_v9, %v349_v45  ;;  %vm392_vm15 = vcmask 1040384  }
  0x78   :  { %v345_v14 = vrot.slane %v344_v54, 1  ;;  %v358_v15 = vadd.f32 %v357_v55, %v356_v48  ;;  %v364_v16 = vrot.slane %v363_v60, 2  ;;  %v393_v26 = vsel %vm392_vm15, %v375_v7, 0.0 }
  0x79   :  { %v339_v17 = vmul.f32 %v335_v51, %v285_v61  ;;  %v352_v12 = vrot.slane %v351_v6, 1  ;;  %v396_v18 = vsel %vm392_vm15, %v379_v13, 0.0 }
  0x7a   :  { %v346_v22 = vadd.f32 %v345_v14, %v344_v54  ;;  %v359_v63 = vrot.slane %v358_v15, 1  ;;  %v365_v23 = vadd.f32 %v364_v16, %v363_v60 }
  0x7b   :  { %v383_v0 = vrot.slane %v339_v17, %v813_v4  ;;  %v387_v24 = vrot.slane %v339_v17, %v816_v5  ;;  %v353_v58 = vadd.f32 %v352_v12, %v351_v6 }
  0x7c   :  { %v360_v27 = vadd.f32 %v359_v63, %v358_v15  ;;  %v366_v25 = vrot.slane %v365_v23, 1 }
  0x7d   :  { %v394_v28 = vsel %vm392_vm15, %v383_v0, 0.0  ;;  %v397_v31 = vsel %vm392_vm15, %v387_v24, 0.0 }
  0x7e   :  { %v367_v2 = vadd.f32 %v366_v25, %v365_v23  ;;  %v368_v32 = vadd.f32 %v360_v27, %v346_v22  ;;  %v395_v3 = vadd.f32 %v394_v28, %v393_v26  ;;  %v398_v52 = vadd.f32 %v397_v31, %v396_v18 }
  0x80   :  { %v369_v33 = vadd.f32 %v367_v2, %v353_v58  ;;  %v427_v35 = vcombine.low %v395_v3, %v398_v52 }
  0x82   :  { %v402_v36 = vcombine.low %v368_v32, %v369_v33  ;;  %v434_v8 = vrot.slane %v427_v35, %v846_v11 }
  0x84   :  { %v409_v53 = vrot.slane %v402_v36, %v846_v11  ;;  %v441_v59 = vrot.slane %v434_v8, %v846_v11 }
  0x86   :  { %v416_v56 = vrot.slane %v409_v53, %v846_v11  ;;  %v443_v20 = vadd.f32 %v441_v59, %v424_v34 }
  0x88   :  { %v418_v37 = vadd.f32 %v416_v56, %v399_v19  ;;  %444 = vst.msk [vmem:[#allocation3] sm:$0x3] %vm802_vm0, %v443_v20 }
  0x8a   :  { %423 = vst.msk [vmem:[#allocation2] sm:$0x3] %vm802_vm0, %v418_v37  ;;  %vm464_vm0 = vcmask 0  }
  0x8f   :  { %v466_v40 = vld [vmem:[#allocation3] sm:$0x3] }
  0x90   :  { %v471_v41 = vrot.slane %v466_v40, %v813_v4  ;;  %v475_v30 = vrot.slane %v466_v40, %v816_v5 }
  0x91   :  { %v447_v42 = vld [vmem:[#allocation2] sm:$0x3] }
  0x92   :  { %v452_v21 = vrot.slane %v447_v42, %v813_v4  ;;  %v456_v10 = vrot.slane %v447_v42, %v816_v5  ;;  %v478_v38 = vsel %vm392_vm15, %v471_v41, 0.0  ;;  %v479_v39 = vsel %vm392_vm15, %v475_v30, 0.0 }
  0x93   :  { %v480_v43 = vadd.f32 %v479_v39, %v478_v38 }
  0x94   :  { %v459_v11 = vsel %vm392_vm15, %v452_v21, 0.0  ;;  %v460_v57 = vsel %vm392_vm15, %v456_v10, 0.0 }
  0x95   :  { %v461_v1 = vadd.f32 %v460_v57, %v459_v11 }
  0x97   :  { %462 = vadd.xlane.f32.xlu0 %v461_v1 }
  0x9b   :  { %481 = vadd.xlane.f32.xlu0 %v480_v43 }
 0x124   :  { %v463_v44 = vpop.xlane.xlu0 %462 }
 0x125   :  { %465 = vst.msk [vmem:[#allocation9] sm:$0x1] %vm464_vm0, %v463_v44 }
 0x126   :  { %706 = shalt.err (!%p703_p6)
}
 0x127   :  { %s707_s19 = scalar_lea.hbm %s1062_s2, 16 }
 0x128   :  { %p708_p7 = scmp.ne.s32.totalorder %s1062_s2, %s707_s19  ;;  %p711_p8 = scmp.lt.u32.totalorder %s707_s19, %s1062_s2 }
 0x12a   :  { %p713_p9 = pnand %p711_p8, %p708_p7 }
 0x12c   :  { %716 = shalt.err (!%p713_p9)
}
 0x12d   :  { %493 = dma.vmem_to_hbm [thread:$0]  %s491_s12, 16, %s1062_s2, [#allocation6]   ;;  %v482_v4 = vpop.xlane.xlu0 %481 }
 0x12e   :  { %483 = vst.msk [vmem:[#allocation10] sm:$0x1] %vm464_vm0, %v482_v4  ;;  %s717_s26 = scalar_lea.vmem %s501_s14, 16  ;;  %s721_s27 = scalar_lea.vmem %s501_s14, 32 }
 0x12f   :  { %p718_p10 = scmp.ne.s32.totalorder %s501_s14, %s717_s26  ;;  %p722_p11 = scmp.lt.s32.totalorder %s501_s14, %s501_s14 }
 0x130   :  { %p723_p12 = scmp.lt.s32.totalorder %s721_s27, %s717_s26 }
 0x132   :  { %p724_p13 = por %p723_p12, %p722_p11 }
 0x134   :  { %p725_p0 = pnand %p724_p13, %p718_p10 }
 0x136   :  { %728 = shalt.err (!%p725_p0)
}
 0x137   :  { %s729_s30 = scalar_lea.hbm %s1063_s3, 16 }
 0x138   :  { %p730_p1 = scmp.ne.s32.totalorder %s1063_s3, %s729_s30  ;;  %p733_p2 = scmp.lt.u32.totalorder %s729_s30, %s1063_s3 }
 0x13a   :  { %p735_p3 = pnand %p733_p2, %p730_p1 }
 0x13c   :  { %738 = shalt.err (!%p735_p3)
}
 0x13d   :  { %503 = dma.vmem_to_hbm [thread:$0]  %s501_s14, 16, %s1063_s3, [#allocation11]  }
 0x13e   :  { %743 = dma.done.wait [#allocation6], 16  }
 0x13f   :  { %744 = vsyncadd [#allocation6], 4294967280 }
 0x140   :  { %745 = dma.done.wait [#allocation11], 16  }
 0x141   :  { %746 = vsyncadd [#allocation11], 4294967280 }
 0x142   :  { %510 = vsyncpa [#allocation5], 1 }
 0x143   :  { %511 = vsyncpa [#allocation8], 1 }
 0x144   :  { %512 = vsyncpa [#allocation6], 1 }
 0x145   :  { %513 = vsyncpa [#allocation11], 1 }

</bundles_post_ra>
